<compile_context>
chip_gen: v5e
topology: v5e:2x2
jax: 0.10.0
libtpu: 0.0.40
codegen_flags: <defaults>
</compile_context>

<pallas_src>
import functools

import jax
import jax.numpy as jnp
from jax.experimental import pallas as pl
from jax.experimental.pallas import tpu as pltpu


def _round_up(v, m):
    return ((v + m - 1) // m) * m


def _sublane_multiple(dtype) -> int:
    itemsize = jnp.dtype(dtype).itemsize
    if itemsize >= 4:
        return 8
    if itemsize == 2:
        return 16
    return 32


def _vmem_capacity_bytes() -> int:
    try:
        cap = getattr(pltpu.get_tpu_info(), "vmem_capacity_bytes", None)
        if cap:
            return int(cap)
    except Exception:
        pass
    return 64 * 1024 * 1024  # conservative default: v7x per-TC VMEM


def _dense_relu_kernel(x_ref, w_ref, b_ref, o_ref, acc_ref):
    # x_ref: (tm, tk), w_ref: (tk, tn), b_ref: (1, tn), o_ref/acc_ref: (tm, tn)
    k = pl.program_id(2)

    @pl.when(k == 0)
    def _():
        acc_ref[...] = jnp.zeros_like(acc_ref)

    acc_ref[...] += jnp.dot(x_ref[...], w_ref[...],
                            preferred_element_type=jnp.float32)

    @pl.when(k == pl.num_programs(2) - 1)
    def _():
        y = acc_ref[...] + b_ref[...]        # bias broadcast over rows (VPU)
        y = jnp.maximum(y, 0.0)              # ReLU (Dense default activation)
        o_ref[...] = y.astype(o_ref.dtype)
    # TODO(synk): Dense(dropout > 0) would need pltpu.prng_seed /
    # pltpu.prng_random_bits masking; default dropout=0.0 is Identity.


def prepare_dense_params(weight, bias=None, compute_dtype=None):
    """One-time parameter prep (call at init, NOT per forward call).

    Transposes the PyTorch-convention weight [D_out, D_in] to [D_in, D_out]
    and zero-pads D_out to a multiple of 128 so output stores are lane-dense.
    Optionally casts stored weights (e.g. bf16) while keeping f32 accumulation.
    """
    d_out, d_in = weight.shape
    d_out_p = _round_up(d_out, 128)
    w_t = weight.T
    if bias is None:
        bias = jnp.zeros((d_out,), weight.dtype)
    if d_out_p != d_out:
        w_t = jnp.pad(w_t, ((0, 0), (0, d_out_p - d_out)))
        bias = jnp.pad(bias, (0, d_out_p - d_out))
    if compute_dtype is not None:
        w_t = w_t.astype(compute_dtype)
    b2 = bias.reshape(1, d_out_p).astype(jnp.float32)
    return jnp.asarray(w_t), jnp.asarray(b2), d_out


@functools.partial(jax.jit, static_argnames=("d_out",))
def dense_forward(x, w_t, b2, d_out):
    """y = relu(x @ W.T + b); W supplied pre-transposed/padded as w_t=[D_in, D_out_p]."""
    *lead, d_in = x.shape
    d_in_w, d_out_p = w_t.shape
    assert d_in == d_in_w, (d_in, d_in_w)

    x2 = x.reshape(-1, d_in)
    n = x2.shape[0]

    in_bytes = jnp.dtype(x2.dtype).itemsize
    w_bytes = jnp.dtype(w_t.dtype).itemsize
    out_bytes = in_bytes
    sub = _sublane_multiple(x2.dtype)

    vmem_cap = _vmem_capacity_bytes()
    budget = int(vmem_cap * 0.70)  # leave headroom for compiler temporaries

    def working_set(tm, tk, tn):
        # double-buffered pipeline operands + single f32 accumulator scratch
        return (2 * (tm * tk * in_bytes + tk * tn * w_bytes
                     + tn * 4 + tm * tn * out_bytes)
                + tm * tn * 4)

    # ---- tile selection (static Python at trace time) -----------------------
    tn = d_out_p                              # full width: weight streams once
    tk = d_in                                 # full contraction in-block
    tm = min(1024, _round_up(n, sub))         # big row tiles for pipelining

    # Shrink tm first (to a soft floor), then tile K (exact divisors only so no
    # garbage enters the contraction), then shrink tn / tm to the hard floors.
    tm_soft_floor = max(sub, 256)
    while working_set(tm, tk, tn) > budget and tm > tm_soft_floor:
        tm = max(tm_soft_floor, _round_up(tm // 2, sub))
    if working_set(tm, tk, tn) > budget:
        for cand in (2048, 1024, 512, 256, 128):
            if d_in % cand == 0 and working_set(tm, cand, tn) <= budget:
                tk = cand
                break
    while working_set(tm, tk, tn) > budget and tn > 128:
        tn = max(128, _round_up(tn // 2, 128))
    while working_set(tm, tk, tn) > budget and tm > sub:
        tm = max(sub, _round_up(tm // 2, sub))

    rows = pl.cdiv(n, tm)
    cols = pl.cdiv(d_out_p, tn)
    kt = pl.cdiv(d_in, tk)

    # v7x has 2 TensorCores: make sure a tiny problem still yields >= 2
    # parallel blocks (neutral on single-core v5e/v6e).
    if rows * cols == 1:
        if n >= 2 * sub:
            tm = _round_up(pl.cdiv(n, 2), sub)
            rows = pl.cdiv(n, tm)
        elif d_out_p >= 256:
            tn = _round_up(d_out_p // 2, 128)
            cols = pl.cdiv(d_out_p, tn)

    # Grid order: keep the larger operand VMEM-resident across the inner sweep
    # (only matters when both spatial axes are split and K is not tiled).
    x_total = n * d_in * in_bytes
    w_total = d_in * d_out_p * w_bytes
    cols_outer = (rows > 1 and cols > 1 and kt == 1
                  and rows * w_total > cols * x_total)

    if cols_outer:
        grid = (cols, rows, kt)
        x_map = lambda j, i, k: (i, k)
        w_map = lambda j, i, k: (k, j)
        b_map = lambda j, i, k: (0, j)
        o_map = lambda j, i, k: (i, j)
    else:
        grid = (rows, cols, kt)
        x_map = lambda i, j, k: (i, k)
        w_map = lambda i, j, k: (k, j)
        b_map = lambda i, j, k: (0, j)
        o_map = lambda i, j, k: (i, j)

    # Actual HBM traffic of this schedule (advisory for XLA scheduling).
    x_traffic = x_total * (1 if (cols == 1 or (kt == 1 and not cols_outer)) else cols)
    w_traffic = w_total * (1 if (rows == 1 or (kt == 1 and (cols == 1 or cols_outer))) else rows)
    bytes_accessed = x_traffic + w_traffic + d_out_p * 4 + n * d_out_p * out_bytes

    ws = working_set(tm, tk, tn)
    vmem_limit = int(min(vmem_cap - (8 << 20), max(ws + (8 << 20), 32 << 20)))

    out = pl.pallas_call(
        _dense_relu_kernel,
        out_shape=jax.ShapeDtypeStruct((n, d_out_p), x.dtype),
        grid_spec=pltpu.PrefetchScalarGridSpec(
            num_scalar_prefetch=0,
            grid=grid,
            in_specs=[
                pl.BlockSpec((tm, tk), x_map),
                pl.BlockSpec((tk, tn), w_map),
                pl.BlockSpec((1, tn), b_map),
            ],
            out_specs=pl.BlockSpec((tm, tn), o_map),
            scratch_shapes=[pltpu.VMEM((tm, tn), jnp.float32)],
        ),
        compiler_params=pltpu.CompilerParams(
            dimension_semantics=("parallel", "parallel", "arbitrary"),
            vmem_limit_bytes=vmem_limit,
        ),
        cost_estimate=pl.CostEstimate(
            flops=2 * n * d_in * d_out_p,
            transcendentals=0,
            bytes_accessed=int(bytes_accessed),
        ),
    )(x2, w_t, b2)

    # Slice off the D_out lane padding and restore leading dims (no row padding
    # was added, so no row slicing is needed).
    out = out[:, :d_out]
    return out.reshape((*lead, d_out))


if __name__ == "__main__":
    # Dense(input_size=32, output_size=64, activation='relu', dropout=0.0, bias=True)
    input_size, output_size = 32, 64
    batch, seq = 2, 8

    key = jax.random.PRNGKey(0)
    kx, kw, kb = jax.random.split(key, 3)

    # nn.Linear.reset_parameters-style init: U(-1/sqrt(fan_in), 1/sqrt(fan_in))
    bound = 1.0 / (input_size ** 0.5)
    weight = jax.random.uniform(
        kw, (output_size, input_size), jnp.float32, -bound, bound)
    bias = jax.random.uniform(kb, (output_size,), jnp.float32, -bound, bound)
    x = jax.random.normal(kx, (batch, seq, input_size), jnp.float32)

    # One-time parameter prep (transpose + lane padding), then the kernel call.
    w_t, b2, d_out = prepare_dense_params(weight, bias)
    y = dense_forward(x, w_t, b2, d_out=d_out)
    y = jax.block_until_ready(y)

    # Reference check in plain JAX.
    y_ref = jnp.maximum(jnp.einsum("bsi,oi->bso", x, weight) + bias, 0.0)
    assert y.shape == (batch, seq, output_size)
    assert jnp.allclose(y, y_ref, atol=1e-5, rtol=1e-5), \
        float(jnp.max(jnp.abs(y - y_ref)))

    print("KERNEL_OK")
</pallas_src>

<mosaic_0001>
module attributes {stable_mosaic.version = 11 : i64} {
  func.func @_dense_relu_kernel(%arg0: i32, %arg1: i32, %arg2: i32, %arg3: memref<8x32xf32, #tpu.memory_space<vmem>>, %arg4: memref<32x128xf32, #tpu.memory_space<vmem>>, %arg5: memref<1x128xf32, #tpu.memory_space<vmem>>, %arg6: memref<8x128xf32, #tpu.memory_space<vmem>>, %arg7: memref<8x128xf32, #tpu.memory_space<vmem>>) attributes {dimension_semantics = [#tpu.dimension_semantics<parallel>, #tpu.dimension_semantics<parallel>, #tpu.dimension_semantics<arbitrary>], iteration_bounds = array<i64: 2, 1, 1>, scalar_prefetch = 0 : i64, scratch_operands = 1 : i64, tpu.core_type = #tpu.core_type<tc>, window_params = [{transform_indices = @transform_0, window_bounds = array<i64: 8, 32>}, {transform_indices = @transform_1, window_bounds = array<i64: 32, 128>}, {transform_indices = @transform_2, window_bounds = array<i64: 1, 128>}, {transform_indices = @transform_3, window_bounds = array<i64: 8, 128>}]} {
    %c0_i32 = arith.constant 0 : i32
    %0 = arith.cmpi eq, %arg2, %c0_i32 : i32
    %1 = arith.extui %0 : i1 to i32
    %c0_i32_0 = arith.constant 0 : i32
    %2 = arith.cmpi ne, %1, %c0_i32_0 : i32
    scf.if %2 {
      %cst_10 = arith.constant 0.000000e+00 : f32
      %12 = vector.broadcast %cst_10 : f32 to vector<8x128xf32>
      %c0_11 = arith.constant 0 : index
      %c0_12 = arith.constant 0 : index
      %13 = vector.load %arg7[%c0_11, %c0_12] : memref<8x128xf32, #tpu.memory_space<vmem>>, vector<8x128xf32>
      tpu.vector_store %arg7[%c0_11, %c0_12], %12 {strides = array<i32>} : memref<8x128xf32, #tpu.memory_space<vmem>>, vector<8x128xf32>,
    } else {
    }
    %c0 = arith.constant 0 : index
    %c0_1 = arith.constant 0 : index
    %3 = vector.load %arg7[%c0, %c0_1] : memref<8x128xf32, #tpu.memory_space<vmem>>, vector<8x128xf32>
    %c0_2 = arith.constant 0 : index
    %c0_3 = arith.constant 0 : index
    %4 = vector.load %arg3[%c0_2, %c0_3] : memref<8x32xf32, #tpu.memory_space<vmem>>, vector<8x32xf32>
    %c0_4 = arith.constant 0 : index
    %c0_5 = arith.constant 0 : index
    %5 = vector.load %arg4[%c0_4, %c0_5] : memref<32x128xf32, #tpu.memory_space<vmem>>, vector<32x128xf32>
    %cst = arith.constant dense<0.000000e+00> : vector<8x128xf32>
    %6 = tpu.matmul %4, %5, %cst {dimension_numbers = #tpu.dot_dimension_numbers<[1], [0], [0], [1], [0, 0, 1, 1], [], []>} : vector<8x32xf32>, vector<32x128xf32>, vector<8x128xf32> -> vector<8x128xf32>
    %7 = arith.addf %3, %6 : vector<8x128xf32>
    %c0_6 = arith.constant 0 : index
    %c0_7 = arith.constant 0 : index
    %8 = vector.load %arg7[%c0_6, %c0_7] : memref<8x128xf32, #tpu.memory_space<vmem>>, vector<8x128xf32>
    tpu.vector_store %arg7[%c0_6, %c0_7], %7 {strides = array<i32>} : memref<8x128xf32, #tpu.memory_space<vmem>>, vector<8x128xf32>,
    %c0_i32_8 = arith.constant 0 : i32
    %9 = arith.cmpi eq, %arg2, %c0_i32_8 : i32
    %10 = arith.extui %9 : i1 to i32
    %c0_i32_9 = arith.constant 0 : i32
    %11 = arith.cmpi ne, %10, %c0_i32_9 : i32
    scf.if %11 {
      %c0_10 = arith.constant 0 : index
      %c0_11 = arith.constant 0 : index
      %12 = vector.load %arg7[%c0_10, %c0_11] : memref<8x128xf32, #tpu.memory_space<vmem>>, vector<8x128xf32>
      %c0_12 = arith.constant 0 : index
      %c0_13 = arith.constant 0 : index
      %13 = vector.load %arg5[%c0_12, %c0_13] : memref<1x128xf32, #tpu.memory_space<vmem>>, vector<1x128xf32>
      %14 = vector.broadcast %13 : vector<1x128xf32> to vector<8x128xf32>
      %15 = arith.addf %12, %14 : vector<8x128xf32>
      %cst_14 = arith.constant 0.000000e+00 : f32
      %16 = vector.broadcast %cst_14 : f32 to vector<8x128xf32>
      %17 = arith.maximumf %15, %16 : vector<8x128xf32>
      %c0_15 = arith.constant 0 : index
      %c0_16 = arith.constant 0 : index
      %18 = vector.load %arg6[%c0_15, %c0_16] : memref<8x128xf32, #tpu.memory_space<vmem>>, vector<8x128xf32>
      tpu.vector_store %arg6[%c0_15, %c0_16], %17 {strides = array<i32>} : memref<8x128xf32, #tpu.memory_space<vmem>>, vector<8x128xf32>,
    } else {
    }
    return
  }
  func.func @transform_0(%arg0: i32, %arg1: i32, %arg2: i32) -> (i32, i32) {
    %c0_i32 = arith.constant 0 : i32
    return %arg0, %arg2 : i32, i32
  }
  func.func @transform_1(%arg0: i32, %arg1: i32, %arg2: i32) -> (i32, i32) {
    %c0_i32 = arith.constant 0 : i32
    return %arg2, %arg1 : i32, i32
  }
  func.func @transform_2(%arg0: i32, %arg1: i32, %arg2: i32) -> (i32, i32) {
    %c0_i32 = arith.constant 0 : i32
    %c0_i32_0 = arith.constant 0 : i32
    return %c0_i32, %arg1 : i32, i32
  }
  func.func @transform_3(%arg0: i32, %arg1: i32, %arg2: i32) -> (i32, i32) {
    %c0_i32 = arith.constant 0 : i32
    return %arg0, %arg1 : i32, i32
  }
}

</mosaic_0001>

<bundles_post_ra>
// kernel: dense_forward.1
= control target key start
LH: loop header
LB: loop body
LE: loop exit
PB: predicated region body
PF: predicated region fallthrough
CT: control target
= control target key end

     0   :  { %8 = vsyncpa [#allocation4], 0  ;;  %s762_s0 = inlined_call_operand.hbm [shape: f32[16,32], index: 0, kind: input, shape index: {}]   ;;  %s763_s1 = inlined_call_operand.hbm [shape: f32[32,128], index: 1, kind: input, shape index: {}]   ;;  %s764_s2 = inlined_call_operand.vmem [shape: f32[1,128], index: 2, kind: input, shape index: {}]   ;;  %s765_s3 = inlined_call_operand.vmem [shape: f32[16,128], index: 3, kind: output, shape index: {}]  }
   0x1   :  { %10 = vsyncpa [#allocation4 + $0x1], 0 }
   0x2   :  { %11 = vsyncpa [#allocation6], 0  ;;  %s645_s12 = smov 0   ;;  %s647_s13 = smov 0  }
   0x3   :  { %s649_s14 = smov 0   ;;  %s651_s15 = smov 0  }
   0x4   :  { %s653_s16 = smov 0   ;;  %s655_s17 = smov 0  }
   0x5 LB: > { %s422_s18 = sadd.s32 4294967295, %s620_s17   ;;  %p424_p0 = scmp.ge.s32.totalorder %s620_s17, 1  ;;  %s620_s17 = sphi %s655_s17, %s17_s17   ;;  %s616_s16 = sphi %s653_s16, %s774_s16   ;;  %s612_s15 = sphi %s651_s15, %s773_s15   ;;  %s608_s14 = sphi %s649_s14, %s772_s14   ;;  %s604_s13 = sphi %s647_s13, %s771_s13   ;;  %s600_s12 = sphi %s645_s12, %s770_s12  }
   0x6   : > { %p677_p1 = scmp.eq.s32.totalorder %s422_s18, 0  ;;  %p151_p2 = scmp.lt.s32.totalorder %s620_s17, 3 }
   0x7   : > { %s166_s22 = sshll.u32 %s763_s1, 4  ;;  %s622_s24 = smov [#allocation5]   ;;  %s167_s22 = int_to_ptr.hbm [resolvable:$true] %s166_s22 }
   0x8   : > { %p685_p3 = pnand %p424_p0, %p151_p2  ;;  %s168_s25 = sshll.u32 %s622_s24, 4  ;;  %s169_s25 = int_to_ptr.vmem [resolvable:$true] %s168_s25 }
   0x9   : > { %s623_s26 = smov 128   ;;  %s624_s27 = smov 8  }
   0xa   : > { %p443_p4 = pneg %p685_p3  ;;  %s36_s28 = sadd.s32 1, %s616_s16 }
   0xb   : > { %p38_p6 = scmp.ge.s32.totalorder %s36_s28, 2  ;;  %p52_p7 = scmp.ne.s32.totalorder %s608_s14, %s604_s13 }
   0xc   : > { %p444_p5 = pnand %p443_p4, %p677_p1  ;;  %p53_p8 = scmp.eq.s32.totalorder %s620_s17, 0 }
   0xd   : > { %s776_s28 = smov (%p38_p6, %s36_s28), 0  ;;  %s45_s29 = sadd.s32 1, %s608_s14 }
   0xe   : > { %446 = dma.hbm_to_vmem [thread:$0]  (!%p444_p5), %s167_s22, 512, %s169_s25, [#allocation6], %s623_s26, %s623_s26, %s624_s27  }
   0xf   : > { %p58_p9 = scmp.ne.s32.totalorder %s604_s13, %s600_s12  ;;  %s40_s30 = ssub.s32 %s616_s16, %s776_s28 }
  0x10   : > { %p704_p10 = por %p53_p8, %p52_p7  ;;  %p43_p11 = scmp.eq.s32.totalorder %s40_s30, 0 }
  0x11   : > { %p710_p12 = por %p677_p1, %p58_p9  ;;  %s188_s6 = sand.u32 1, %s608_s14  }
  0x12   : > { %s429_s7 = sshll.u32 %s616_s16, 3  ;;  %p452_p13 = scmp.lt.s32.totalorder %s620_s17, 2 }
  0x13   : > { %s717_s8 = scalar_select %p43_p11, %s608_s14, %s45_s29  }
  0x14   : > { %s428_s9 = sshll.u32 %s188_s6, 3  ;;  %s197_s12 = scalar_lea.hbm %s762_s0, %s429_s7 }
  0x15   : > { %s199_s18 = sshll.u32 %s197_s12, 4  ;;  %s192_s20 = scalar_lea.vmem [#allocation3], %s428_s9  ;;  %s200_s18 = int_to_ptr.hbm [resolvable:$true] %s199_s18 }
  0x16   : > { %s201_s21 = sshll.u32 %s192_s20, 4  ;;  %p448_p0 = pnand %p452_p13, %p704_p10  ;;  %s202_s21 = int_to_ptr.vmem [resolvable:$true] %s201_s21 }
  0x17   : > { %s189_s22 = scalar_lea.sflag [#allocation4], %s188_s6  ;;  %210 = sbr.rel (%p685_p3) target bundleno = 170 (0xaa), region = 32 }
  0x18   : > { %450 = dma.hbm_to_vmem [thread:$0]  (!%p448_p0), %s200_s18, 128, %s202_s21, %s189_s22  }
  0x19   : > { %s212_s24 = sand.u32 (!%p685_p3), 1, %s604_s13  }
  0x1a   : > { %s431_s25 = sshll.u32 (!%p685_p3), %s212_s24, 3  ;;  %s213_s26 = scalar_lea.sflag (!%p685_p3), [#allocation4], %s212_s24 }
  0x1b   : > { %s216_s27 = scalar_lea.vmem (!%p685_p3), [#allocation3], %s431_s25 }
  0x1c   : > { %591 = dma.done.wait (%p710_p12), %s213_s26, 128  }
  0x1d   : > { %593 = vsyncadd (%p710_p12), %s213_s26, 4294967168 }
  0x1e   : > { %595 = dma.done.wait (%p677_p1), [#allocation6], 512  }
  0x1f   : > { %597 = vsyncadd (%p677_p1), [#allocation6], 4294966784  ;;  %v271_v0 = vld [vmem:[#allocation5 + $0x18] sm:$0xff]  ;;  %v270_v1 = vld [vmem:[#allocation5 + $0x10] sm:$0xff]  ;;  %vm272_vm0 = vcmask 261120   ;;  %p254_p2 = scmp.lt.s32.totalorder %s612_s15, 1 }
  0x20   : > { %288 = vmatpush.msra.mxu0 %v271_v0  ;;  %v269_v2 = vld [vmem:[#allocation5 + $0x8] sm:$0xff]  ;;  %v268_v3 = vld [vmem:[#allocation5] sm:$0xff]  ;;  %v267_v4 = vld [vmem:[%s216_s27] sm:$0xff] }
  0x21   : > { %s778_s15 = smov (!%p254_p2, %s612_s15), 1  ;;  %v505_v5 = vld [vmem:[%s764_s2] ss:$0 sm:$0xff] }
  0x22   : > { %289 = vmatpush.msra.mxu0 %v270_v1  ;;  %s433_s19 = sshll.u32 %s778_s15, 3 }
  0x23   : > { %s260_s5 = scalar_lea.vmem %s765_s3, %s433_s19 }
  0x24   : > { %290 = vmatpush.msra.mxu0 %v269_v2 }
  0x26   : > { %291 = vmatpush.msra.mxu0 %v268_v3 }
  0x27   : > { %434 = vmatmul.msk.f32.vlgmr.msra.gmra.mxu0 %vm272_vm0, %v267_v4 }
  0xa4   : > { %v293_v6 = vpop.f32.mrf.mxu0 }
  0xa5   : > { %v306_v7 = vadd.f32 %v505_v5, %v293_v6 }
  0xa7   : > { %v307_v8 = vmax.f32 %v306_v7, 0.0 }
  0xa9   : > { %308 = vst [vmem:[%s260_s5] sm:$0xff] %v307_v8 }
  0xaa PF: > { %s17_s17 = sadd.s32 1, %s620_s17   ;;  %s770_s12 = smov %s604_s13 }
  0xab   : > { %p14_p1 = scmp.ge.s32.totalorder %s17_s17, 4   ;;  %s771_s13 = smov %s608_s14 }
  0xac   : > { %s772_s14 = smov %s717_s8  ;;  %s773_s15 = smov %s616_s16 }
  0xad   : > { %s774_s16 = smov %s776_s28  ;;  %16 = sbr.rel (!%p14_p1) target bundleno = 5 (0x5), region = 88 }
  0xb2   :  { %334 = vsyncpa [#allocation4], 1 }
  0xb3   :  { %336 = vsyncpa [#allocation4 + $0x1], 1 }
  0xb4   :  { %337 = vsyncpa [#allocation6], 1 }

</bundles_post_ra>
